<compile_context>
chip_gen: v7x
topology: tpu7x:2x2x1
jax: 0.10.0
libtpu: 0.0.40
codegen_flags: <defaults>
</compile_context>

<pallas_src>
import math

import jax
import jax.numpy as jnp
from jax.experimental import pallas as pl
from jax.experimental.pallas import tpu as pltpu


# ----------------------------- in-kernel math ------------------------------

def _erf(x):
    # Abramowitz & Stegun 7.1.26 polynomial, |err| < 1.5e-7 (~f32 eps).
    # Only needs exp/mul/add/select, all of which lower cleanly in Mosaic.
    a1 = 0.254829592
    a2 = -0.284496736
    a3 = 1.421413741
    a4 = -1.453152027
    a5 = 1.061405429
    p = 0.3275911
    sgn = jnp.where(x >= 0.0, 1.0, -1.0)
    ax = jnp.abs(x)
    t = 1.0 / (1.0 + p * ax)
    poly = ((((a5 * t + a4) * t + a3) * t + a2) * t + a1) * t
    return sgn * (1.0 - poly * jnp.exp(-ax * ax))


def _gelu_exact(x):
    # Matches torch.nn.GELU() (erf-based, NOT the tanh approximation).
    return 0.5 * x * (1.0 + _erf(x * 0.7071067811865476))


def _make_kernel(num_layers):
    """Kernel over one batch tile: fused Linear/GELU stack.

    refs = (x_ref, w0, b0, w1, b1, ..., out_ref)
      x_ref : (tm, D0)        VMEM
      wi    : (Di, Di+1)      VMEM (already transposed from torch (out, in))
      bi    : (1, Di+1)       VMEM
      out   : (tm, D_last)    VMEM
    """

    def kernel(*refs):
        x_ref = refs[0]
        out_ref = refs[-1]
        prefs = refs[1:-1]
        h = x_ref[...].astype(jnp.float32)
        for li in range(num_layers):
            w = prefs[2 * li][...]
            b = prefs[2 * li + 1][...]          # (1, Dout) -> broadcast once
            h = jnp.dot(h, w, preferred_element_type=jnp.float32) + b
            if li < num_layers - 1:
                h = _gelu_exact(h)
        out_ref[...] = h.astype(out_ref.dtype)

    return kernel


# ------------------------------ model wrapper ------------------------------

class ANNPallas:
    """JAX/Pallas port of ANNModel (MLP with GELU between hidden layers)."""

    def __init__(self, layer_dims, key):
        assert len(layer_dims) >= 2
        self.layer_dims = list(layer_dims)
        self.params = []
        # torch nn.Linear init: U(-1/sqrt(fan_in), 1/sqrt(fan_in)) for W and b.
        for i in range(len(layer_dims) - 1):
            din, dout = layer_dims[i], layer_dims[i + 1]
            key, kw, kb = jax.random.split(key, 3)
            bound = 1.0 / math.sqrt(din)
            # stored as (in, out) so the kernel does x @ W with no transpose
            w = jax.random.uniform(kw, (din, dout), jnp.float32, -bound, bound)
            b = jax.random.uniform(kb, (1, dout), jnp.float32, -bound, bound)
            self.params += [w, b]

    def __call__(self, x):
        B, D0 = x.shape
        assert D0 == self.layer_dims[0]
        d_out = self.layer_dims[-1]
        L = len(self.layer_dims) - 1

        # Batch tile: multiple of 8 (sublane) when possible; grid over batch is
        # marked "parallel" so v7x shards it across both TensorCores.
        if B % 8 == 0:
            tm = 8 if B > 8 else B
        else:
            tm = B
        grid = (B // tm,)

        x = x.astype(jnp.float32)

        in_specs = [pl.BlockSpec((tm, D0), lambda i: (i, 0))]
        for li in range(L):
            din, dout = self.layer_dims[li], self.layer_dims[li + 1]
            in_specs.append(pl.BlockSpec((din, dout), lambda i: (0, 0)))
            in_specs.append(pl.BlockSpec((1, dout), lambda i: (0, 0)))

        out = pl.pallas_call(
            _make_kernel(L),
            out_shape=jax.ShapeDtypeStruct((B, d_out), jnp.float32),
            grid=grid,
            in_specs=in_specs,
            out_specs=pl.BlockSpec((tm, d_out), lambda i: (i, 0)),
            compiler_params=pltpu.CompilerParams(
                dimension_semantics=("parallel",)),
        )(x, *self.params)
        return out


# ------------------------- pure-JAX reference check -------------------------

def _reference(x, params, layer_dims):
    h = x.astype(jnp.float32)
    L = len(layer_dims) - 1
    for li in range(L):
        w = params[2 * li]          # (in, out)
        b = params[2 * li + 1]      # (1, out)
        h = h @ w + b
        if li < L - 1:
            h = jax.nn.gelu(h, approximate=False)
    return h


# ----------------------------------- main -----------------------------------

if __name__ == "__main__":
    key = jax.random.PRNGKey(0)
    key, kparam, kx = jax.random.split(key, 3)

    # layer_dims starts and ends with nr_spacediscr; lane-dense (multiples of
    # 128) hidden sizes, small batch split into two parallel grid steps.
    layer_dims = [256, 128, 128, 256]
    B = 16

    model = ANNPallas(layer_dims, kparam)
    x = jax.random.normal(kx, (B, layer_dims[0]), jnp.float32)

    y = model(x)
    jax.block_until_ready(y)
    assert y.shape == (B, layer_dims[-1])

    y_ref = _reference(x, model.params, layer_dims)
    max_err = float(jnp.max(jnp.abs(y - y_ref)))
    assert max_err < 1e-4, f"mismatch vs reference: {max_err}"

    print("KERNEL_OK")
</pallas_src>

<mosaic_0001>
module attributes {stable_mosaic.version = 11 : i64} {
  func.func @kernel(%arg0: i32, %arg1: memref<8x256xf32, #tpu.memory_space<vmem>>, %arg2: memref<256x128xf32, #tpu.memory_space<vmem>>, %arg3: memref<1x128xf32, #tpu.memory_space<vmem>>, %arg4: memref<128x128xf32, #tpu.memory_space<vmem>>, %arg5: memref<1x128xf32, #tpu.memory_space<vmem>>, %arg6: memref<128x256xf32, #tpu.memory_space<vmem>>, %arg7: memref<1x256xf32, #tpu.memory_space<vmem>>, %arg8: memref<8x256xf32, #tpu.memory_space<vmem>>) attributes {dimension_semantics = [#tpu.dimension_semantics<parallel>], iteration_bounds = array<i64: 2>, scalar_prefetch = 0 : i64, scratch_operands = 0 : i64, tpu.core_type = #tpu.core_type<tc>, window_params = [{transform_indices = @transform_0, window_bounds = array<i64: 8, 256>}, {pipeline_mode = #tpu.pipeline_mode<synchronous>, transform_indices = @transform_1, window_bounds = array<i64: 256, 128>}, {pipeline_mode = #tpu.pipeline_mode<synchronous>, transform_indices = @transform_2, window_bounds = array<i64: 1, 128>}, {pipeline_mode = #tpu.pipeline_mode<synchronous>, transform_indices = @transform_3, window_bounds = array<i64: 128, 128>}, {pipeline_mode = #tpu.pipeline_mode<synchronous>, transform_indices = @transform_4, window_bounds = array<i64: 1, 128>}, {pipeline_mode = #tpu.pipeline_mode<synchronous>, transform_indices = @transform_5, window_bounds = array<i64: 128, 256>}, {pipeline_mode = #tpu.pipeline_mode<synchronous>, transform_indices = @transform_6, window_bounds = array<i64: 1, 256>}, {transform_indices = @transform_7, window_bounds = array<i64: 8, 256>}]} {
    %c0 = arith.constant 0 : index
    %c0_0 = arith.constant 0 : index
    %0 = vector.load %arg1[%c0, %c0_0] : memref<8x256xf32, #tpu.memory_space<vmem>>, vector<8x256xf32>
    %c0_1 = arith.constant 0 : index
    %c0_2 = arith.constant 0 : index
    %1 = vector.load %arg2[%c0_1, %c0_2] : memref<256x128xf32, #tpu.memory_space<vmem>>, vector<256x128xf32>
    %c0_3 = arith.constant 0 : index
    %c0_4 = arith.constant 0 : index
    %2 = vector.load %arg3[%c0_3, %c0_4] : memref<1x128xf32, #tpu.memory_space<vmem>>, vector<1x128xf32>
    %cst = arith.constant dense<0.000000e+00> : vector<8x128xf32>
    %3 = tpu.matmul %0, %1, %cst {dimension_numbers = #tpu.dot_dimension_numbers<[1], [0], [0], [1], [0, 0, 1, 1], [], []>} : vector<8x256xf32>, vector<256x128xf32>, vector<8x128xf32> -> vector<8x128xf32>
    %4 = vector.broadcast %2 : vector<1x128xf32> to vector<8x128xf32>
    %5 = arith.addf %3, %4 : vector<8x128xf32>
    %cst_5 = arith.constant 5.000000e-01 : f32
    %6 = vector.broadcast %cst_5 : f32 to vector<8x128xf32>
    %7 = arith.mulf %6, %5 : vector<8x128xf32>
    %cst_6 = arith.constant 0.707106769 : f32
    %8 = vector.broadcast %cst_6 : f32 to vector<8x128xf32>
    %9 = arith.mulf %5, %8 : vector<8x128xf32>
    %cst_7 = arith.constant 0.000000e+00 : f32
    %10 = vector.broadcast %cst_7 : f32 to vector<8x128xf32>
    %11 = arith.cmpf oge, %9, %10 : vector<8x128xf32>
    %cst_8 = arith.constant 1.000000e+00 : f32
    %cst_9 = arith.constant -1.000000e+00 : f32
    %12 = vector.broadcast %cst_8 : f32 to vector<8x128xf32>
    %13 = vector.broadcast %cst_9 : f32 to vector<8x128xf32>
    %14 = arith.select %11, %12, %13 : vector<8x128xi1>, vector<8x128xf32>
    %15 = math.absf %9 : vector<8x128xf32>
    %cst_10 = arith.constant 0.327591091 : f32
    %16 = vector.broadcast %cst_10 : f32 to vector<8x128xf32>
    %17 = arith.mulf %16, %15 : vector<8x128xf32>
    %cst_11 = arith.constant 1.000000e+00 : f32
    %18 = vector.broadcast %cst_11 : f32 to vector<8x128xf32>
    %19 = arith.addf %18, %17 : vector<8x128xf32>
    %cst_12 = arith.constant 1.000000e+00 : f32
    %20 = vector.broadcast %cst_12 : f32 to vector<8x128xf32>
    %21 = arith.divf %20, %19 : vector<8x128xf32>
    %cst_13 = arith.constant 1.06140542 : f32
    %22 = vector.broadcast %cst_13 : f32 to vector<8x128xf32>
    %23 = arith.mulf %22, %21 : vector<8x128xf32>
    %cst_14 = arith.constant -1.45315206 : f32
    %24 = vector.broadcast %cst_14 : f32 to vector<8x128xf32>
    %25 = arith.addf %23, %24 : vector<8x128xf32>
    %26 = arith.mulf %25, %21 : vector<8x128xf32>
    %cst_15 = arith.constant 1.42141378 : f32
    %27 = vector.broadcast %cst_15 : f32 to vector<8x128xf32>
    %28 = arith.addf %26, %27 : vector<8x128xf32>
    %29 = arith.mulf %28, %21 : vector<8x128xf32>
    %cst_16 = arith.constant -0.284496725 : f32
    %30 = vector.broadcast %cst_16 : f32 to vector<8x128xf32>
    %31 = arith.addf %29, %30 : vector<8x128xf32>
    %32 = arith.mulf %31, %21 : vector<8x128xf32>
    %cst_17 = arith.constant 0.254829586 : f32
    %33 = vector.broadcast %cst_17 : f32 to vector<8x128xf32>
    %34 = arith.addf %32, %33 : vector<8x128xf32>
    %35 = arith.mulf %34, %21 : vector<8x128xf32>
    %cst_18 = arith.constant 0.000000e+00 : f32
    %36 = vector.broadcast %cst_18 : f32 to vector<8x128xf32>
    %37 = arith.subf %36, %15 : vector<8x128xf32>
    %38 = arith.mulf %37, %15 : vector<8x128xf32>
    %39 = math.exp %38 : vector<8x128xf32>
    %40 = arith.mulf %35, %39 : vector<8x128xf32>
    %cst_19 = arith.constant 1.000000e+00 : f32
    %41 = vector.broadcast %cst_19 : f32 to vector<8x128xf32>
    %42 = arith.subf %41, %40 : vector<8x128xf32>
    %43 = arith.mulf %14, %42 : vector<8x128xf32>
    %cst_20 = arith.constant 1.000000e+00 : f32
    %44 = vector.broadcast %cst_20 : f32 to vector<8x128xf32>
    %45 = arith.addf %44, %43 : vector<8x128xf32>
    %46 = arith.mulf %7, %45 : vector<8x128xf32>
    %c0_21 = arith.constant 0 : index
    %c0_22 = arith.constant 0 : index
    %47 = vector.load %arg4[%c0_21, %c0_22] : memref<128x128xf32, #tpu.memory_space<vmem>>, vector<128x128xf32>
    %c0_23 = arith.constant 0 : index
    %c0_24 = arith.constant 0 : index
    %48 = vector.load %arg5[%c0_23, %c0_24] : memref<1x128xf32, #tpu.memory_space<vmem>>, vector<1x128xf32>
    %cst_25 = arith.constant dense<0.000000e+00> : vector<8x128xf32>
    %49 = tpu.matmul %46, %47, %cst_25 {dimension_numbers = #tpu.dot_dimension_numbers<[1], [0], [0], [1], [0, 0, 1, 1], [], []>} : vector<8x128xf32>, vector<128x128xf32>, vector<8x128xf32> -> vector<8x128xf32>
    %50 = vector.broadcast %48 : vector<1x128xf32> to vector<8x128xf32>
    %51 = arith.addf %49, %50 : vector<8x128xf32>
    %cst_26 = arith.constant 5.000000e-01 : f32
    %52 = vector.broadcast %cst_26 : f32 to vector<8x128xf32>
    %53 = arith.mulf %52, %51 : vector<8x128xf32>
    %cst_27 = arith.constant 0.707106769 : f32
    %54 = vector.broadcast %cst_27 : f32 to vector<8x128xf32>
    %55 = arith.mulf %51, %54 : vector<8x128xf32>
    %cst_28 = arith.constant 0.000000e+00 : f32
    %56 = vector.broadcast %cst_28 : f32 to vector<8x128xf32>
    %57 = arith.cmpf oge, %55, %56 : vector<8x128xf32>
    %cst_29 = arith.constant 1.000000e+00 : f32
    %cst_30 = arith.constant -1.000000e+00 : f32
    %58 = vector.broadcast %cst_29 : f32 to vector<8x128xf32>
    %59 = vector.broadcast %cst_30 : f32 to vector<8x128xf32>
    %60 = arith.select %57, %58, %59 : vector<8x128xi1>, vector<8x128xf32>
    %61 = math.absf %55 : vector<8x128xf32>
    %cst_31 = arith.constant 0.327591091 : f32
    %62 = vector.broadcast %cst_31 : f32 to vector<8x128xf32>
    %63 = arith.mulf %62, %61 : vector<8x128xf32>
    %cst_32 = arith.constant 1.000000e+00 : f32
    %64 = vector.broadcast %cst_32 : f32 to vector<8x128xf32>
    %65 = arith.addf %64, %63 : vector<8x128xf32>
    %cst_33 = arith.constant 1.000000e+00 : f32
    %66 = vector.broadcast %cst_33 : f32 to vector<8x128xf32>
    %67 = arith.divf %66, %65 : vector<8x128xf32>
    %cst_34 = arith.constant 1.06140542 : f32
    %68 = vector.broadcast %cst_34 : f32 to vector<8x128xf32>
    %69 = arith.mulf %68, %67 : vector<8x128xf32>
    %cst_35 = arith.constant -1.45315206 : f32
    %70 = vector.broadcast %cst_35 : f32 to vector<8x128xf32>
    %71 = arith.addf %69, %70 : vector<8x128xf32>
    %72 = arith.mulf %71, %67 : vector<8x128xf32>
    %cst_36 = arith.constant 1.42141378 : f32
    %73 = vector.broadcast %cst_36 : f32 to vector<8x128xf32>
    %74 = arith.addf %72, %73 : vector<8x128xf32>
    %75 = arith.mulf %74, %67 : vector<8x128xf32>
    %cst_37 = arith.constant -0.284496725 : f32
    %76 = vector.broadcast %cst_37 : f32 to vector<8x128xf32>
    %77 = arith.addf %75, %76 : vector<8x128xf32>
    %78 = arith.mulf %77, %67 : vector<8x128xf32>
    %cst_38 = arith.constant 0.254829586 : f32
    %79 = vector.broadcast %cst_38 : f32 to vector<8x128xf32>
    %80 = arith.addf %78, %79 : vector<8x128xf32>
    %81 = arith.mulf %80, %67 : vector<8x128xf32>
    %cst_39 = arith.constant 0.000000e+00 : f32
    %82 = vector.broadcast %cst_39 : f32 to vector<8x128xf32>
    %83 = arith.subf %82, %61 : vector<8x128xf32>
    %84 = arith.mulf %83, %61 : vector<8x128xf32>
    %85 = math.exp %84 : vector<8x128xf32>
    %86 = arith.mulf %81, %85 : vector<8x128xf32>
    %cst_40 = arith.constant 1.000000e+00 : f32
    %87 = vector.broadcast %cst_40 : f32 to vector<8x128xf32>
    %88 = arith.subf %87, %86 : vector<8x128xf32>
    %89 = arith.mulf %60, %88 : vector<8x128xf32>
    %cst_41 = arith.constant 1.000000e+00 : f32
    %90 = vector.broadcast %cst_41 : f32 to vector<8x128xf32>
    %91 = arith.addf %90, %89 : vector<8x128xf32>
    %92 = arith.mulf %53, %91 : vector<8x128xf32>
    %c0_42 = arith.constant 0 : index
    %c0_43 = arith.constant 0 : index
    %93 = vector.load %arg6[%c0_42, %c0_43] : memref<128x256xf32, #tpu.memory_space<vmem>>, vector<128x256xf32>
    %c0_44 = arith.constant 0 : index
    %c0_45 = arith.constant 0 : index
    %94 = vector.load %arg7[%c0_44, %c0_45] : memref<1x256xf32, #tpu.memory_space<vmem>>, vector<1x256xf32>
    %cst_46 = arith.constant dense<0.000000e+00> : vector<8x256xf32>
    %95 = tpu.matmul %92, %93, %cst_46 {dimension_numbers = #tpu.dot_dimension_numbers<[1], [0], [0], [1], [0, 0, 1, 1], [], []>} : vector<8x128xf32>, vector<128x256xf32>, vector<8x256xf32> -> vector<8x256xf32>
    %96 = vector.broadcast %94 : vector<1x256xf32> to vector<8x256xf32>
    %97 = arith.addf %95, %96 : vector<8x256xf32>
    %c0_47 = arith.constant 0 : index
    %c0_48 = arith.constant 0 : index
    %98 = vector.load %arg8[%c0_47, %c0_48] : memref<8x256xf32, #tpu.memory_space<vmem>>, vector<8x256xf32>
    tpu.vector_store %arg8[%c0_47, %c0_48], %97 {strides = array<i32>} : memref<8x256xf32, #tpu.memory_space<vmem>>, vector<8x256xf32>,
    return
  }
  func.func @transform_0(%arg0: i32) -> (i32, i32) {
    %c0_i32 = arith.constant 0 : i32
    %c0_i32_0 = arith.constant 0 : i32
    return %arg0, %c0_i32 : i32, i32
  }
  func.func @transform_1(%arg0: i32) -> (i32, i32) {
    %c0_i32 = arith.constant 0 : i32
    %c0_i32_0 = arith.constant 0 : i32
    %c0_i32_1 = arith.constant 0 : i32
    return %c0_i32, %c0_i32_0 : i32, i32
  }
  func.func @transform_2(%arg0: i32) -> (i32, i32) {
    %c0_i32 = arith.constant 0 : i32
    %c0_i32_0 = arith.constant 0 : i32
    %c0_i32_1 = arith.constant 0 : i32
    return %c0_i32, %c0_i32_0 : i32, i32
  }
  func.func @transform_3(%arg0: i32) -> (i32, i32) {
    %c0_i32 = arith.constant 0 : i32
    %c0_i32_0 = arith.constant 0 : i32
    %c0_i32_1 = arith.constant 0 : i32
    return %c0_i32, %c0_i32_0 : i32, i32
  }
  func.func @transform_4(%arg0: i32) -> (i32, i32) {
    %c0_i32 = arith.constant 0 : i32
    %c0_i32_0 = arith.constant 0 : i32
    %c0_i32_1 = arith.constant 0 : i32
    return %c0_i32, %c0_i32_0 : i32, i32
  }
  func.func @transform_5(%arg0: i32) -> (i32, i32) {
    %c0_i32 = arith.constant 0 : i32
    %c0_i32_0 = arith.constant 0 : i32
    %c0_i32_1 = arith.constant 0 : i32
    return %c0_i32, %c0_i32_0 : i32, i32
  }
  func.func @transform_6(%arg0: i32) -> (i32, i32) {
    %c0_i32 = arith.constant 0 : i32
    %c0_i32_0 = arith.constant 0 : i32
    %c0_i32_1 = arith.constant 0 : i32
    return %c0_i32, %c0_i32_0 : i32, i32
  }
  func.func @transform_7(%arg0: i32) -> (i32, i32) {
    %c0_i32 = arith.constant 0 : i32
    %c0_i32_0 = arith.constant 0 : i32
    return %arg0, %c0_i32 : i32, i32
  }
}

</mosaic_0001>

<bundles_post_ra>
// kernel: tpu_custom_call.1
= control target key start
LH: loop header
LB: loop body
LE: loop exit
PB: predicated region body
PF: predicated region fallthrough
CT: control target
= control target key end

     0   :  { %12 = vsyncpa [#allocation3], 0  ;;  %s1636_s0 = inlined_call_operand.hbm [shape: f32[16,256], index: 0, kind: input, shape index: {}]   ;;  %s1637_s1 = inlined_call_operand.hbm [shape: f32[256,128], index: 1, kind: input, shape index: {}]   ;;  %s1638_s2 = inlined_call_operand.vmem [shape: f32[1,128], index: 2, kind: input, shape index: {}]   ;;  %s1639_s3 = inlined_call_operand.hbm [shape: f32[128,128], index: 3, kind: input, shape index: {}]   ;;  %s1640_s4 = inlined_call_operand.vmem [shape: f32[1,128], index: 4, kind: input, shape index: {}]   ;;  %s1641_s5 = inlined_call_operand.hbm [shape: f32[128,256], index: 5, kind: input, shape index: {}]   ;;  %s1642_s6 = inlined_call_operand.vmem [shape: f32[1,256], index: 6, kind: input, shape index: {}]   ;;  %s1643_s7 = inlined_call_operand.hbm [shape: f32[16,256], index: 7, kind: output, shape index: {}]  }
   0x1   :  { %14 = vsyncpa [#allocation3 + $0x1], 0 }
   0x2   :  { %15 = vsyncpa [#allocation6], 0 }
   0x3   :  { %16 = vsyncpa [#allocation9], 0 }
   0x4   :  { %17 = vsyncpa [#allocation4], 0 }
   0x5   :  { %19 = vsyncpa [#allocation4 + $0x1], 0  ;;  %s1363_s24 = smov 0   ;;  %s1365_s25 = smov 0  }
   0x6   :  { %s1367_s26 = smov 0   ;;  %s1369_s27 = smov 0  }
   0x7 LB: > { %s1384_s28 = sadd.s32 4294967295, %s1308_s27   ;;  %s828_s29 = sadd.s32 4294967294, %s1308_s27   ;;  %s1308_s27 = sphi %s1369_s27, %s1669_s27   ;;  %s1304_s26 = sphi %s1367_s26, %s1668_s26   ;;  %s1300_s25 = sphi %s1365_s25, %s1667_s25   ;;  %s1296_s24 = sphi %s1363_s24, %s1666_s24  }
   0x8   : > { %p45_p0 = scmp.ne.s32.totalorder %s1300_s25, %s1296_s24  ;;  %p1644_p1 = scmp.eq.s32.totalorder %s1384_s28, 0 }
   0x9   : > { %p201_p3 = scmp.eq.s32.totalorder %s828_s29, 1  ;;  %p829_p5 = scmp.ge.s32.totalorder %s1308_s27, 1 }
   0xa   : > { %p1393_p4 = por %p1644_p1, %p45_p0  ;;  %p208_p7 = scmp.lt.s32.totalorder %s1308_s27, 3 }
   0xb   : > { %p1398_p6 = por %p201_p3, %p45_p0  ;;  %s1310_s10 = smov [#allocation5]  }
   0xc   : > { %s1648_s30 = scalar_select %p1393_p4, 1, 0 }
   0xd   : > { %s1649_s8 = scalar_select %p1398_p6, 1, 0 }
   0xe   : > { %p1403_p8 = pnand %p829_p5, %p208_p7  ;;  %s220_s11 = sshll.u32 %s1310_s10, 4  ;;  %s1407_s11 = int_to_ptr.vmem [resolvable:$true] %s220_s11 }
   0xf   : > { %1650 = sst [smem:[#allocation15_spill]] %s1649_s8  ;;  %s1311_s13 = smov [#allocation7]  }
  0x10   : > { %s1651_s9 = scalar_select %p1403_p8, 1, 0 }
  0x11   : > { %p1043_p9 = pneg %p1403_p8  ;;  %s236_s14 = sshll.u32 %s1311_s13, 4  ;;  %s1418_s14 = int_to_ptr.vmem [resolvable:$true] %s236_s14 }
  0x12   : > { %s1312_s15 = smov [#allocation8]   ;;  %s1120_s19 = scalar_lea.hbm %s1637_s1, 4096 }
  0x13   : > { %p1414_p11 = pnand %p1043_p9, %p1644_p1  ;;  %s1420_s16 = sshll.u32 %s1312_s15, 4  ;;  %s253_s16 = int_to_ptr.vmem [resolvable:$true] %s1420_s16 }
  0x14   : > { %p1121_p12 = scmp.ne.s32.totalorder %s1637_s1, %s1120_s19  ;;  %p1127_p5 = scmp.lt.u32.totalorder %s1120_s19, %s1637_s1 }
  0x15   : > { %p1430_p13 = pneg %p1414_p11 }
  0x17   : > { %p1123_p0 = pnand %p1430_p13, %p1121_p12 }
  0x19   : > { %p1124_p3 = pneg %p1123_p0 }
  0x1b   : > { %p1129_p7 = pnand %p1127_p5, %p1124_p3 }
  0x1d   : > { %1132 = shalt.err (!%p1129_p7)
}
  0x1e   : > { %s1133_s10 = scalar_lea.vmem %s1407_s11, 4096  ;;  %p1141_p2 = scmp.lt.s32.totalorder %s1407_s11, %s1407_s11 }
  0x1f   : > { %p1134_p9 = scmp.ne.s32.totalorder %s1407_s11, %s1133_s10  ;;  %p1142_p6 = scmp.lt.s32.totalorder %s1133_s10, %s1133_s10 }
  0x21   : > { %p1136_p10 = pnand %p1134_p9, %p1430_p13  ;;  %p1143_p12 = por %p1142_p6, %p1141_p2 }
  0x23   : > { %p1137_p1 = pneg %p1136_p10 }
  0x25   : > { %p1144_p0 = pnand %p1143_p12, %p1137_p1 }
  0x27   : > { %1147 = shalt.err (!%p1144_p0)
}
  0x28   : > { %s1313_s13 = smov 128   ;;  %s1314_s15 = smov 8  }
  0x29   : > { %1046 = dma.hbm_to_vmem [thread:$0]  (!%p1414_p11), %s1637_s1, 4096, %s1407_s11, [#allocation6], %s1313_s13, %s1313_s13, %s1314_s15  }
  0x2a   : > { %s1148_s21 = scalar_lea.hbm %s1639_s3, 2048 }
  0x2b   : > { %p1149_p2 = scmp.ne.s32.totalorder %s1639_s3, %s1148_s21  ;;  %p1155_p10 = scmp.lt.u32.totalorder %s1148_s21, %s1639_s3 }
  0x2d   : > { %p1151_p1 = pnand %p1149_p2, %p1430_p13 }
  0x2f   : > { %p1152_p6 = pneg %p1151_p1 }
  0x31   : > { %p1157_p3 = pnand %p1155_p10, %p1152_p6 }
  0x33   : > { %1160 = shalt.err (!%p1157_p3)
}
  0x34   : > { %s1161_s11 = scalar_lea.vmem %s1418_s14, 2048  ;;  %p1169_p12 = scmp.lt.s32.totalorder %s1418_s14, %s1418_s14 }
  0x35   : > { %p1162_p5 = scmp.ne.s32.totalorder %s1418_s14, %s1161_s11  ;;  %p1170_p0 = scmp.lt.s32.totalorder %s1161_s11, %s1161_s11 }
  0x37   : > { %p1164_p7 = pnand %p1162_p5, %p1430_p13  ;;  %p1171_p2 = por %p1170_p0, %p1169_p12 }
  0x39   : > { %p1165_p9 = pneg %p1164_p7 }
  0x3b   : > { %p1172_p1 = pnand %p1171_p2, %p1165_p9 }
  0x3d   : > { %1175 = shalt.err (!%p1172_p1)
}
  0x3e   : > { %1049 = dma.hbm_to_vmem [thread:$0]  (!%p1414_p11), %s1639_s3, 2048, %s1418_s14, [#allocation6], %s1313_s13, %s1313_s13, %s1314_s15  }
  0x3f   : > { %s1176_s20 = scalar_lea.hbm %s1641_s5, 4096 }
  0x40   : > { %p1177_p6 = scmp.ne.s32.totalorder %s1641_s5, %s1176_s20  ;;  %p1183_p5 = scmp.lt.u32.totalorder %s1176_s20, %s1641_s5 }
  0x42   : > { %p1179_p10 = pnand %p1177_p6, %p1430_p13 }
  0x44   : > { %p1180_p3 = pneg %p1179_p10 }
  0x46   : > { %p1185_p7 = pnand %p1183_p5, %p1180_p3 }
  0x48   : > { %1188 = shalt.err (!%p1185_p7)
}
  0x49   : > { %s1189_s11 = scalar_lea.vmem %s253_s16, 4096  ;;  %p1197_p2 = scmp.lt.s32.totalorder %s253_s16, %s253_s16 }
  0x4a   : > { %p1190_p9 = scmp.ne.s32.totalorder %s253_s16, %s1189_s11  ;;  %p1198_p1 = scmp.lt.s32.totalorder %s1189_s11, %s1189_s11 }
  0x4c   : > { %p1192_p12 = pnand %p1190_p9, %p1430_p13  ;;  %p1199_p4 = por %p1198_p1, %p1197_p2 }
  0x4e   : > { %p1193_p0 = pneg %p1192_p12 }
  0x50   : > { %p1200_p8 = pnand %p1199_p4, %p1193_p0 }
  0x52   : > { %1203 = shalt.err (!%p1200_p8)
}
  0x53   : > { %s1315_s14 = smov 256   ;;  %s1316_s22 = smov 16  }
  0x54   : > { %1052 = dma.hbm_to_vmem [thread:$0]  (!%p1414_p11), %s1641_s5, 4096, %s253_s16, [#allocation9], %s1315_s14, %s1315_s14, %s1316_s22  }
  0x55   : > { %s1494_s8 = sadd.s32 1, %s1308_s27   ;;  %s32_s18 = sadd.s32 1, %s1304_s26 }
  0x56   : > { %s29_s17 = ssub.s32 %s1308_s27, %s1494_s8  ;;  %p39_p8 = scmp.ne.s32.totalorder %s1304_s26, %s1300_s25 }
  0x57   : > { %p30_p4 = scmp.eq.s32.totalorder %s29_s17, 0  ;;  %p40_p13 = scmp.eq.s32.totalorder %s1308_s27, 0 }
  0x58   : > { %p1064_p6 = scmp.lt.s32.totalorder %s1308_s27, 2  ;;  %p1654_p3 = scmp.eq.s32.totalorder %s1384_s28, 1 }
  0x59   : > { %s1504_s19 = scalar_select %p30_p4, %s1304_s26, %s32_s18  }
  0x5a   : > { %p41_p10 = por %p40_p13, %p39_p8  ;;  %p1508_p5 = por %p1654_p3, %p39_p8 }
  0x5b   : > { %s269_s12 = sand.u32 1, %s1304_s26   ;;  %s850_s21 = sshll.u32 %s1308_s27, 8 }
  0x5c   : > { %s834_s16 = sshll.u32 %s269_s12, 4  ;;  %s1517_s10 = scalar_lea.hbm %s1636_s0, %s850_s21 }
  0x5d   : > { %s273_s11 = scalar_lea.vmem [#allocation2], %s834_s16  ;;  %p1519_p11 = pnand %p1064_p6, %p41_p10 }
  0x5e   : > { %s281_s14 = sshll.u32 %s273_s11, 4  ;;  %s270_s13 = scalar_lea.sflag [#allocation3], %s269_s12  ;;  %s1523_s14 = int_to_ptr.vmem [resolvable:$true] %s281_s14 }
  0x5f   : > { %s1204_s15 = scalar_lea.hbm %s1517_s10, 256  ;;  %p1206_p9 = pneg %p1519_p11 }
  0x60   : > { %p1205_p7 = scmp.ne.s32.totalorder %s1517_s10, %s1204_s15  ;;  %s1209_s21 = scalar_lea.hbm %s1636_s0, 512 }
  0x61   : > { %p1210_p2 = scmp.lt.u32.totalorder %s1517_s10, %s1636_s0  ;;  %p1211_p1 = scmp.lt.u32.totalorder %s1209_s21, %s1204_s15 }
  0x62   : > { %p1207_p12 = pnand %p1206_p9, %p1205_p7  ;;  %p1213_p8 = scmp.lt.u32.totalorder %s1204_s15, %s1517_s10 }
  0x63   : > { %p1212_p4 = por %p1211_p1, %p1210_p2 }
  0x64   : > { %p1208_p0 = pneg %p1207_p12 }
  0x65   : > { %p1214_p13 = por %p1213_p8, %p1212_p4 }
  0x67   : > { %p1215_p6 = pnand %p1214_p13, %p1208_p0 }
  0x69   : > { %1218 = shalt.err (!%p1215_p6)
}
  0x6a   : > { %s1219_s12 = scalar_lea.vmem %s1523_s14, 256  ;;  %s1317_s29 = smov [#allocation2]  }
  0x6b   : > { %p1220_p10 = scmp.ne.s32.totalorder %s1523_s14, %s1219_s12  ;;  %s1224_s11 = sshll.u32 %s1317_s29, 4  ;;  %s1225_s11 = int_to_ptr.vmem [resolvable:$false] %s1224_s11 }
  0x6c   : > { %s1226_s17 = scalar_lea.vmem %s1225_s11, 512  ;;  %p1227_p12 = scmp.lt.s32.totalorder %s1523_s14, %s1225_s11 }
  0x6d   : > { %p1222_p3 = pnand %p1220_p10, %p1206_p9  ;;  %p1228_p2 = scmp.lt.s32.totalorder %s1226_s17, %s1219_s12 }
  0x6f   : > { %p1223_p7 = pneg %p1222_p3  ;;  %p1229_p1 = por %p1228_p2, %p1227_p12 }
  0x71   : > { %p1230_p4 = pnand %p1229_p1, %p1223_p7 }
  0x73   : > { %1233 = shalt.err (!%p1230_p4)
}
  0x74   : > { %1056 = dma.hbm_to_vmem [thread:$0]  (!%p1519_p11), %s1517_s10, 256, %s1523_s14, %s270_s13  }
  0x75   : > { %p1657_p0 = scmp.ne.s32.totalorder %s1651_s9, 0 }
  0x76   : > { %s1553_s15 = sand.u32 (!%p1657_p0), 1, %s1300_s25   ;;  %p1658_p9 = scmp.ne.s32.totalorder (!%p1657_p0), %s1648_s30, 0 }
  0x77   : > { %290 = sbr.rel (%p1657_p0) target bundleno = 923 (0x39b), region = 48  ;;  %s838_s18 = sshll.u32 (!%p1657_p0), %s1553_s15, 4 }
  0x78   : > { %s293_s21 = scalar_lea.sflag (!%p1657_p0), [#allocation3], %s1553_s15  ;;  %s1559_s16 = scalar_lea.vmem (!%p1657_p0), [#allocation2], %s838_s18 }
  0x7e   : > { %1279 = dma.done.wait (%p1658_p9), %s293_s21, 256  }
  0x7f   : > { %1281 = vsyncadd (%p1658_p9), %s293_s21, 4294967040  ;;  %p1659_p11 = scmp.eq.s32.totalorder %s1384_s28, 0 }
  0x81   : > { %1283 = dma.done.wait (%p1659_p11), [#allocation6], 6144   ;;  %p1660_p8 = pmov %p1659_p11 }
  0x83   : > { %1285 = vsyncadd (%p1660_p8), [#allocation6], 4294961152  ;;  %p1661_p13 = pmov %p1660_p8 }
  0x84   : > { %p1662_p6 = pmov %p1660_p8 }
  0x85   : > { %1287 = dma.done.wait (%p1661_p13), [#allocation9], 4096  }
  0x86   : > { %1289 = vsyncadd (%p1662_p6), [#allocation9], 4294963200  ;;  %v357_v0 = vld [vmem:[#allocation5 + $0x80] sm:$0xff]  ;;  %v358_v1 = vld [vmem:[#allocation5 + $0x88] sm:$0xff]  ;;  %v1318_v53 = vmov 0.0|0.0   ;;  %vm1319_vm0 = vmmov 0  }
  0x87   : > { %v341_v2 = vld [vmem:[#allocation5] sm:$0xff]  ;;  %v939_v3 = vpack.c.bf16 %v358_v1, %v357_v0  ;;  %v342_v4 = vld [vmem:[#allocation5 + $0x8] sm:$0xff]  ;;  %v359_v5 = vld [vmem:[#allocation5 + $0x90] sm:$0xff]  ;;  %971 = vmatprep.subr.bf16.mxu1 %v1318_v53  ;;  %v1320_v56 = vmov 0.0   ;;  %s851_s23 = sshll.u32 %s1384_s28, 8  ;;  %s338_s12 = scalar_lea.vmem [#allocation10], %s838_s18 }
  0x88   : > { %v360_v6 = vld [vmem:[#allocation5 + $0x98] sm:$0xff]  ;;  %v941_v7 = vpack.c.bf16 %v342_v4, %v341_v2  ;;  %v343_v9 = vld [vmem:[#allocation5 + $0x10] sm:$0xff]  ;;  %v361_v11 = vld [vmem:[#allocation5 + $0xa0] sm:$0xff]  ;;  %936 = vmatprep.mubr.msk.f32.mxu1 %vm1319_vm0, %v1320_v56  ;;  %s729_s29 = sshll.u32 %s338_s12, 4  ;;  %s1592_s21 = scalar_lea.hbm %s1643_s7, %s851_s23  ;;  %s1594_s29 = int_to_ptr.vmem [resolvable:$true] %s729_s29 }
  0x89   : > { %v943_v8 = vpack.c.bf16 %v360_v6, %v359_v5  ;;  %v344_v10 = vld [vmem:[#allocation5 + $0x18] sm:$0xff]  ;;  %940 = vmatprep.subr.bf16.mxu0 %v939_v3  ;;  %v362_v12 = vld [vmem:[#allocation5 + $0xa8] sm:$0xff]  ;;  %v345_v15 = vld [vmem:[#allocation5 + $0x20] sm:$0xff]  ;;  %s715_s28 = scalar_lea.sflag [#allocation4], %s1553_s15  ;;  %s1322_s18 = smov [#allocation10]  }
  0x8a   : > { %942 = vmatpush3.bf16.msra.mxu0 %v941_v7  ;;  %v945_v13 = vpack.c.bf16 %v344_v10, %v343_v9  ;;  %v947_v14 = vpack.c.bf16 %v362_v12, %v361_v11  ;;  %v346_v16 = vld [vmem:[#allocation5 + $0x28] sm:$0xff]  ;;  %v363_v17 = vld [vmem:[#allocation5 + $0xb0] sm:$0xff]  ;;  %v364_v18 = vld [vmem:[#allocation5 + $0xb8] sm:$0xff]  ;;  %s1238_s30 = sshll.u32 %s1322_s18, 4  ;;  %s1239_s30 = int_to_ptr.vmem [resolvable:$false] %s1238_s30 }
  0x8b   : > { %944 = vmatprep.subr.bf16.mxu0 %v943_v8  ;;  %v949_v19 = vpack.c.bf16 %v346_v16, %v345_v15  ;;  %v951_v20 = vpack.c.bf16 %v364_v18, %v363_v17  ;;  %v347_v21 = vld [vmem:[#allocation5 + $0x30] sm:$0xff]  ;;  %v348_v22 = vld [vmem:[#allocation5 + $0x38] sm:$0xff]  ;;  %v365_v23 = vld [vmem:[#allocation5 + $0xc0] sm:$0xff]  ;;  %s1240_s9 = scalar_lea.vmem %s1239_s30, 512  ;;  %p1241_p12 = scmp.lt.s32.totalorder %s1594_s29, %s1239_s30 }
  0x8c   : > { %v366_v24 = vld [vmem:[#allocation5 + $0xc8] sm:$0xff]  ;;  %v953_v26 = vpack.c.bf16 %v348_v22, %v347_v21  ;;  %v349_v28 = vld [vmem:[#allocation5 + $0x40] sm:$0xff]  ;;  %v367_v30 = vld [vmem:[#allocation5 + $0xd0] sm:$0xff] }
  0x8d   : > { %v340_v25 = vld [vmem:[%s1559_s16 + $0x8] sm:$0xff]  ;;  %v955_v27 = vpack.c.bf16 %v366_v24, %v365_v23  ;;  %v351_v34 = vld [vmem:[#allocation5 + $0x50] sm:$0xff]  ;;  %v369_v36 = vld [vmem:[#allocation5 + $0xe0] sm:$0xff] }
  0x8e   : > { %946 = vmatpush3.bf16.msra.mxu0 %v945_v13  ;;  %444 = vmatprep.mubr.f32.mxu0 %v340_v25  ;;  %v350_v29 = vld [vmem:[#allocation5 + $0x48] sm:$0xff]  ;;  %v368_v31 = vld [vmem:[#allocation5 + $0xd8] sm:$0xff]  ;;  %v353_v40 = vld [vmem:[#allocation5 + $0x60] sm:$0xff] }
  0x8f   : > { %948 = vmatprep.subr.bf16.mxu0 %v947_v14  ;;  %v957_v32 = vpack.c.bf16 %v350_v29, %v349_v28  ;;  %v959_v33 = vpack.c.bf16 %v368_v31, %v367_v30  ;;  %v352_v35 = vld [vmem:[#allocation5 + $0x58] sm:$0xff]  ;;  %v370_v37 = vld [vmem:[#allocation5 + $0xe8] sm:$0xff]  ;;  %v371_v42 = vld [vmem:[#allocation5 + $0xf0] sm:$0xff] }
  0x90   : > { %v961_v38 = vpack.c.bf16 %v352_v35, %v351_v34  ;;  %v963_v39 = vpack.c.bf16 %v370_v37, %v369_v36  ;;  %v354_v41 = vld [vmem:[#allocation5 + $0x68] sm:$0xff]  ;;  %v372_v43 = vld [vmem:[#allocation5 + $0xf8] sm:$0xff]  ;;  %v355_v46 = vld [vmem:[#allocation5 + $0x70] sm:$0xff]  ;;  %v1321_v37 = vmov -1.0  }
  0x91   : > { %v965_v44 = vpack.c.bf16 %v354_v41, %v353_v40  ;;  %v967_v45 = vpack.c.bf16 %v372_v43, %v371_v42  ;;  %v356_v47 = vld [vmem:[#allocation5 + $0x78] sm:$0xff]  ;;  %v339_v49 = vld [vmem:[%s1559_s16] sm:$0xff]  ;;  %v478_v51 = vld [vmem:[#allocation7 + $0x8] sm:$0xff]  ;;  %s1234_s16 = scalar_lea.vmem %s1594_s29, 256 }
  0x92   : > { %950 = vmatpush3.bf16.msra.mxu0 %v949_v19  ;;  %v969_v48 = vpack.c.bf16 %v356_v47, %v355_v46  ;;  %v477_v50 = vld [vmem:[#allocation7] sm:$0xff]  ;;  %v479_v52 = vld [vmem:[#allocation7 + $0x10] sm:$0xff]  ;;  %v480_v55 = vld [vmem:[#allocation7 + $0x18] sm:$0xff]  ;;  %p1235_p10 = scmp.ne.s32.totalorder %s1594_s29, %s1234_s16  ;;  %p1242_p2 = scmp.lt.s32.totalorder %s1240_s9, %s1234_s16 }
  0x93   : > { %952 = vmatprep.subr.bf16.mxu0 %v951_v20  ;;  %v972_v54 = vpack.c.bf16 %v478_v51, %v477_v50  ;;  %v975_v57 = vpack.c.bf16 %v480_v55, %v479_v52  ;;  %v481_v58 = vld [vmem:[#allocation7 + $0x20] sm:$0xff]  ;;  %v482_v59 = vld [vmem:[#allocation7 + $0x28] sm:$0xff]  ;;  %v483_v61 = vld [vmem:[#allocation7 + $0x30] sm:$0xff] }
  0x94   : > { %v978_v60 = vpack.c.bf16 %v482_v59, %v481_v58  ;;  %v484_v62 = vld [vmem:[#allocation7 + $0x38] sm:$0xff]  ;;  %v485_v0 = vld [vmem:[#allocation7 + $0x40] sm:$0xff]  ;;  %v486_v1 = vld [vmem:[#allocation7 + $0x48] sm:$0xff]  ;;  %p1236_p3 = pnand %p1235_p10, %p1508_p5  ;;  %p1243_p1 = por %p1242_p2, %p1241_p12 }
  0x95   : > { %973 = vmatpush3.bf16.msra.mxu1 %v972_v54  ;;  %v981_v63 = vpack.c.bf16 %v484_v62, %v483_v61  ;;  %v984_v2 = vpack.c.bf16 %v486_v1, %v485_v0  ;;  %v487_v3 = vld [vmem:[#allocation7 + $0x50] sm:$0xff]  ;;  %v488_v4 = vld [vmem:[#allocation7 + $0x58] sm:$0xff]  ;;  %v489_v6 = vld [vmem:[#allocation7 + $0x60] sm:$0xff] }
  0x96   : > { %954 = vmatpush3.bf16.msra.mxu0 %v953_v26  ;;  %974 = vmatprep.subr.bf16.mxu1 %v1318_v53  ;;  %v987_v5 = vpack.c.bf16 %v488_v4, %v487_v3  ;;  %v490_v7 = vld [vmem:[#allocation7 + $0x68] sm:$0xff]  ;;  %v491_v9 = vld [vmem:[#allocation7 + $0x70] sm:$0xff]  ;;  %v492_v10 = vld [vmem:[#allocation7 + $0x78] sm:$0xff]  ;;  %p1237_p7 = pneg %p1236_p3 }
  0x97   : > { %956 = vmatprep.subr.bf16.mxu0 %v955_v27  ;;  %v990_v8 = vpack.c.bf16 %v490_v7, %v489_v6  ;;  %v993_v11 = vpack.c.bf16 %v492_v10, %v491_v9  ;;  %v843_v13 = vld [vmem:[%s1638_s2] ss:$0 sm:$0xff]  ;;  %v598_v43 = vld [vmem:[#allocation8 + $0x8] sm:$0xff]  ;;  %v599_v47 = vld [vmem:[#allocation8 + $0x10] sm:$0xff] }
  0x98   : > { %v597_v46 = vld [vmem:[#allocation8] sm:$0xff]  ;;  %v604_v50 = vld [vmem:[#allocation8 + $0x38] sm:$0xff]  ;;  %v606_v55 = vld [vmem:[#allocation8 + $0x48] sm:$0xff]  ;;  %p1244_p4 = pnand %p1243_p1, %p1237_p7 }
  0x99   : > { %976 = vmatpush3.bf16.msra.mxu1 %v975_v57  ;;  %v601_v52 = vld [vmem:[#allocation8 + $0x20] sm:$0xff]  ;;  %v607_v59 = vld [vmem:[#allocation8 + $0x50] sm:$0xff]  ;;  %v610_v61 = vld [vmem:[#allocation8 + $0x68] sm:$0xff] }
  0x9a   : > { %958 = vmatpush3.bf16.msra.mxu0 %v957_v32  ;;  %977 = vmatprep.subr.bf16.mxu1 %v1318_v53  ;;  %v605_v58 = vld [vmem:[#allocation8 + $0x40] sm:$0xff]  ;;  %v612_v62 = vld [vmem:[#allocation8 + $0x78] sm:$0xff]  ;;  %v611_v1 = vld [vmem:[#allocation8 + $0x70] sm:$0xff] }
  0x9b   : > { %960 = vmatprep.subr.bf16.mxu0 %v959_v33  ;;  %v609_v0 = vld [vmem:[#allocation8 + $0x60] sm:$0xff]  ;;  %v614_v3 = vld [vmem:[#allocation8 + $0x88] sm:$0xff]  ;;  %v616_v4 = vld [vmem:[#allocation8 + $0x98] sm:$0xff] }
  0x9c   : > { %v613_v6 = vld [vmem:[#allocation8 + $0x80] sm:$0xff]  ;;  %v615_v7 = vld [vmem:[#allocation8 + $0x90] sm:$0xff]  ;;  %v618_v9 = vld [vmem:[#allocation8 + $0xa8] sm:$0xff] }
  0x9d   : > { %979 = vmatpush3.bf16.msra.mxu1 %v978_v60  ;;  %v1005_v60 = vpack.c.bf16 %v607_v59, %v605_v58  ;;  %v620_v10 = vld [vmem:[#allocation8 + $0xb8] sm:$0xff] }
  0x9e   : > { %962 = vmatpush3.bf16.msra.mxu0 %v961_v38  ;;  %980 = vmatprep.subr.bf16.mxu1 %v1318_v53 }
  0x9f   : > { %964 = vmatprep.subr.bf16.mxu0 %v963_v39 }
  0xa1   : > { %982 = vmatpush3.bf16.msra.mxu1 %v981_v63  ;;  %v1007_v63 = vpack.c.bf16 %v612_v62, %v610_v61 }
  0xa2   : > { %966 = vmatpush3.bf16.msra.mxu0 %v965_v44  ;;  %983 = vmatprep.subr.bf16.mxu1 %v1318_v53  ;;  %v600_v44 = vld [vmem:[#allocation8 + $0x18] sm:$0xff] }
  0xa3   : > { %968 = vmatprep.subr.bf16.mxu0 %v967_v45  ;;  %v995_v45 = vpack.c.bf16 %v600_v44, %v598_v43 }
  0xa5   : > { %985 = vmatpush3.bf16.msra.mxu1 %v984_v2  ;;  %v1009_v2 = vpack.c.bf16 %v611_v1, %v609_v0 }
  0xa6   : > { %970 = vmatpush3.bf16.msra.mxu0 %v969_v48  ;;  %986 = vmatprep.subr.bf16.mxu1 %v1318_v53  ;;  %v997_v48 = vpack.c.bf16 %v599_v47, %v597_v46 }
  0xa7   : > { %996 = vmatprep.subr.bf16.mxu0 %v995_v45 }
  0xa9   : > { %445 = vmatmul.mubr.f32.vlgmr.msra.gmra.mrb[0].mxu0 %v339_v49  ;;  %988 = vmatpush3.bf16.msra.mxu1 %v987_v5  ;;  %v602_v49 = vld [vmem:[#allocation8 + $0x28] sm:$0xff]  ;;  %v1011_v5 = vpack.c.bf16 %v616_v4, %v614_v3 }
  0xaa   : > { %705 = vmatprep.mubr.f32.mxu0 %v1320_v56  ;;  %989 = vmatprep.subr.bf16.mxu1 %v1318_v53  ;;  %v999_v51 = vpack.c.bf16 %v604_v50, %v602_v49  ;;  %v608_v56 = vld [vmem:[#allocation8 + $0x58] sm:$0xff] }
  0xab   : > { %998 = vmatpush1.bf16.msra.mxu0 %v997_v48  ;;  %v1003_v57 = vpack.c.bf16 %v608_v56, %v606_v55 }
  0xac   : > { %1000 = vmatprep.subr.bf16.mxu0 %v999_v51 }
  0xad   : > { %991 = vmatpush3.bf16.msra.mxu1 %v990_v8  ;;  %v1013_v8 = vpack.c.bf16 %v615_v7, %v613_v6 }
  0xae   : > { %992 = vmatprep.subr.bf16.mxu1 %v1318_v53  ;;  %v603_v53 = vld [vmem:[#allocation8 + $0x30] sm:$0xff] }
  0xaf   : > { %v1001_v54 = vpack.c.bf16 %v603_v53, %v601_v52 }
  0xb1   : > { %994 = vmatpush3.bf16.msra.mxu1 %v993_v11  ;;  %1002 = vmatpush1.bf16.msra.mxu0 %v1001_v54  ;;  %v1015_v11 = vpack.c.bf16 %v620_v10, %v618_v9 }
  0xb2   : > { %1004 = vmatprep.subr.bf16.mxu0 %v1003_v57  ;;  %v631_v57 = vlaneseq }
  0xb4   : > { %v632_v58 = vshrl.u32 %v631_v57, 7 }
  0xb5   : > { %1006 = vmatpush1.bf16.msra.mxu0 %v1005_v60  ;;  %v629_v60 = vld [vmem:[%s1642_s6] sm:$0x3] }
  0xb6   : > { %1008 = vmatprep.subr.bf16.mxu0 %v1007_v63  ;;  %v633_v59 = vsub.s32 0, %v632_v58  ;;  %v637_v61 = vsub.s32 1, %v632_v58 }
  0xb8   : > { %v634_v62 = vrot.slane %v629_v60, %v633_v59  ;;  %v638_v63 = vrot.slane %v629_v60, %v637_v61 }
  0xb9   : > { %1010 = vmatpush1.bf16.msra.mxu0 %v1009_v2 }
  0xba   : > { %1012 = vmatprep.subr.bf16.mxu0 %v1011_v5 }
  0xbd   : > { %1014 = vmatpush1.bf16.msra.mxu0 %v1013_v8 }
  0xbe   : > { %1016 = vmatprep.subr.bf16.mxu0 %v1015_v11 }
 0x17c   : > { %v884_v12 = vpop.f32.mrb[0].mxu0 }
 0x17d   : > { %v885_v14 = vpop.f32.mrb[1].mxu0 }
 0x17e   : > { %v886_v15 = vadd.f32 %v885_v14, %v884_v12  ;;  %v617_v12 = vld [vmem:[#allocation8 + $0xa0] sm:$0xff] }
 0x180   : > { %v447_v16 = vadd.f32 %v886_v15, %v843_v13  ;;  %v619_v13 = vld [vmem:[#allocation8 + $0xb0] sm:$0xff]  ;;  %v622_v15 = vld [vmem:[#allocation8 + $0xc8] sm:$0xff] }
 0x181   : > { %v1017_v14 = vpack.c.bf16 %v619_v13, %v617_v12 }
 0x182   : > { %v451_v17 = vmul.f32 0.70710677, %v447_v16  ;;  %v450_v40 = vmul.f32 0.5, %v447_v16  ;;  %v624_v16 = vld [vmem:[#allocation8 + $0xd8] sm:$0xff] }
 0x183   : > { %1018 = vmatpush1.bf16.msra.mxu0 %v1017_v14 }
 0x184   : > { %v454_v18 = vand.u32 2147483647, %v451_v17  ;;  %vm452_vm1 = vcmp.ge.f32.partialorder %v451_v17, 0.0  ;;  %v1019_v17 = vpack.c.bf16 %v624_v16, %v622_v15 }
 0x185   : > { %v453_v38 = vsel %vm452_vm1, 1.0, %v1321_v37 }
 0x186   : > { %v455_v19 = vmul.f32 0.3275911, %v454_v18  ;;  %v468_v21 = vsub.f32 0.0, %v454_v18  ;;  %1020 = vmatprep.subr.bf16.mxu0 %v1019_v17 }
 0x188   : > { %v456_v20 = vadd.f32 1.0, %v455_v19  ;;  %v469_v23 = vmul.f32 %v468_v21, %v454_v18  ;;  %v621_v18 = vld [vmem:[#allocation8 + $0xc0] sm:$0xff]  ;;  %v623_v19 = vld [vmem:[#allocation8 + $0xd0] sm:$0xff]  ;;  %v626_v21 = vld [vmem:[#allocation8 + $0xe8] sm:$0xff] }
 0x18a   : > { %1112 = vrcp.f32 %v456_v20  ;;  %v470_v26 = vmul.f32 1.442695, %v469_v23  ;;  %v1021_v20 = vpack.c.bf16 %v623_v19, %v621_v18 }
 0x18c   : > { %1114 = vpow2.f32 %v470_v26  ;;  %1022 = vmatpush1.bf16.msra.mxu0 %v1021_v20 }
 0x194   : > { %v1113_v22 = vpop.eup %1112 }
 0x195   : > { %v459_v24 = vmul.f32 1.0614054, %v1113_v22 }
 0x196   : > { %v1115_v34 = vpop.eup %1114 }
 0x197   : > { %v460_v25 = vadd.f32 -1.4531521, %v459_v24  ;;  %v625_v24 = vld [vmem:[#allocation8 + $0xe0] sm:$0xff] }
 0x199   : > { %v461_v27 = vmul.f32 %v1113_v22, %v460_v25  ;;  %v627_v25 = vld [vmem:[#allocation8 + $0xf0] sm:$0xff] }
 0x19a   : > { %v1025_v26 = vpack.c.bf16 %v627_v25, %v625_v24 }
 0x19b   : > { %v462_v28 = vadd.f32 1.4214138, %v461_v27  ;;  %v844_v27 = vld [vmem:[%s1640_s4] ss:$0 sm:$0xff] }
 0x19d   : > { %v463_v29 = vmul.f32 %v1113_v22, %v462_v28 }
 0x19f   : > { %v464_v30 = vadd.f32 -0.28449672, %v463_v29 }
 0x1a1   : > { %v465_v31 = vmul.f32 %v1113_v22, %v464_v30 }
 0x1a3   : > { %v466_v32 = vadd.f32 0.2548296, %v465_v31 }
 0x1a5   : > { %v467_v33 = vmul.f32 %v1113_v22, %v466_v32  ;;  %v628_v22 = vld [vmem:[#allocation8 + $0xf8] sm:$0xff] }
 0x1a6   : > { %v1023_v23 = vpack.c.bf16 %v628_v22, %v626_v21 }
 0x1a7   : > { %v472_v35 = vmul.f32 %v1115_v34, %v467_v33 }
 0x1a8   : > { %1024 = vmatprep.subr.bf16.mxu0 %v1023_v23 }
 0x1a9   : > { %v473_v36 = vsub.f32 1.0, %v472_v35  ;;  %1026 = vmatpush1.bf16.msra.mxu0 %v1025_v26 }
 0x1ab   : > { %v474_v39 = vmul.f32 %v473_v36, %v453_v38 }
 0x1ad   : > { %v475_v41 = vadd.f32 1.0, %v474_v39 }
 0x1af   : > { %v476_v42 = vmul.f32 %v475_v41, %v450_v40 }
 0x1b1   : > { %937 = vmatmul.mubr.f32.vlgmr.msra.gmra.mrb[0].mxu1 %v476_v42 }
 0x284   : > { %v566_v28 = vpop.f32.mrb[0].mxu1 }
 0x285   : > { %v567_v29 = vadd.f32 %v844_v27, %v566_v28  ;;  %v938_v30 = vpop.f32.mrb[1].mxu1 }
 0x287   : > { %v571_v31 = vmul.f32 0.70710677, %v567_v29  ;;  %v570_v54 = vmul.f32 0.5, %v567_v29 }
 0x289   : > { %v574_v32 = vand.u32 2147483647, %v571_v31  ;;  %vm572_vm2 = vcmp.ge.f32.partialorder %v571_v31, 0.0 }
 0x28a   : > { %v573_v52 = vsel %vm572_vm2, 1.0, %v1321_v37 }
 0x28b   : > { %v575_v33 = vmul.f32 0.3275911, %v574_v32  ;;  %v588_v35 = vsub.f32 0.0, %v574_v32 }
 0x28d   : > { %v576_v34 = vadd.f32 1.0, %v575_v33  ;;  %v589_v38 = vmul.f32 %v588_v35, %v574_v32 }
 0x28f   : > { %1116 = vrcp.f32 %v576_v34  ;;  %v590_v41 = vmul.f32 1.442695, %v589_v38 }
 0x291   : > { %1118 = vpow2.f32 %v590_v41 }
 0x299   : > { %v1117_v36 = vpop.eup %1116 }
 0x29a   : > { %v579_v39 = vmul.f32 1.0614054, %v1117_v36 }
 0x29b   : > { %v1119_v49 = vpop.eup %1118 }
 0x29c   : > { %v580_v40 = vadd.f32 -1.4531521, %v579_v39 }
 0x29e   : > { %v581_v42 = vmul.f32 %v1117_v36, %v580_v40 }
 0x2a0   : > { %v582_v43 = vadd.f32 1.4214138, %v581_v42 }
 0x2a2   : > { %v583_v44 = vmul.f32 %v1117_v36, %v582_v43 }
 0x2a4   : > { %v584_v45 = vadd.f32 -0.28449672, %v583_v44 }
 0x2a6   : > { %v585_v46 = vmul.f32 %v1117_v36, %v584_v45 }
 0x2a8   : > { %v586_v47 = vadd.f32 0.2548296, %v585_v46 }
 0x2aa   : > { %v587_v48 = vmul.f32 %v1117_v36, %v586_v47 }
 0x2ac   : > { %v592_v50 = vmul.f32 %v1119_v49, %v587_v48 }
 0x2ae   : > { %v593_v51 = vsub.f32 1.0, %v592_v50 }
 0x2b0   : > { %v594_v53 = vmul.f32 %v593_v51, %v573_v52 }
 0x2b2   : > { %v595_v55 = vadd.f32 1.0, %v594_v53 }
 0x2b4   : > { %v596_v56 = vmul.f32 %v595_v55, %v570_v54 }
 0x2b6   : > { %706 = vmatmul.mubr.f32.vlgmr.msra.gmra.mrb[2].mxu0 %v596_v56 }
 0x389   : > { %v707_v37 = vpop.f32.mrb[2].mxu0 }
 0x38a   : > { %v708_v0 = vadd.f32 %v707_v37, %v634_v62  ;;  %v709_v1 = vpop.f32.mrb[3].mxu0 }
 0x38b   : > { %v710_v2 = vadd.f32 %v709_v1, %v638_v63 }
 0x38c   : > { %712 = vst [vmem:[%s338_s12] sm:$0xff] %v708_v0 }
 0x38d   : > { %713 = vst [vmem:[%s338_s12 + $0x8] sm:$0xff] %v710_v2 }
 0x38e   : > { %1247 = shalt.err (!%p1244_p4)
}
 0x38f   : > { %s1248_s15 = scalar_lea.hbm %s1592_s21, 256  ;;  %s1252_s22 = scalar_lea.hbm %s1643_s7, 512 }
 0x390   : > { %p1249_p0 = scmp.ne.s32.totalorder %s1592_s21, %s1248_s15  ;;  %p1253_p8 = scmp.lt.u32.totalorder %s1592_s21, %s1643_s7 }
 0x391   : > { %p1254_p13 = scmp.lt.u32.totalorder %s1252_s22, %s1248_s15  ;;  %p1256_p10 = scmp.lt.u32.totalorder %s1248_s15, %s1592_s21 }
 0x392   : > { %p1250_p9 = pnand %p1249_p0, %p1508_p5 }
 0x393   : > { %p1255_p6 = por %p1254_p13, %p1253_p8 }
 0x394   : > { %p1251_p11 = pneg %p1250_p9 }
 0x395   : > { %p1257_p3 = por %p1256_p10, %p1255_p6 }
 0x397   : > { %p1258_p7 = pnand %p1257_p3, %p1251_p11 }
 0x399   : > { %1261 = shalt.err (!%p1258_p7)
}
 0x39a   : > { %1041 = dma.vmem_to_hbm [thread:$0]  (%p1508_p5), %s1594_s29, 256, %s1592_s21, %s715_s28  }
 0x39b PF: > { %s1663_s12 = sld [smem:[#allocation15_spill]]  ;;  %s741_s11 = sand.u32 1, %s1296_s24  }
 0x39c   : > { %p1665_p2 = scmp.ge.s32.totalorder %s1308_s27, 2  ;;  %s742_s17 = scalar_lea.sflag [#allocation4], %s741_s11 }
 0x3a1   : > { %p1664_p12 = scmp.ne.s32.totalorder %s1663_s12, 0 }
 0x3a3   : > { %p1058_p1 = pnand %p1665_p2, %p1664_p12 }
 0x3a5   : > { %1291 = dma.done.wait (!%p1058_p1), %s742_s17, 256  }
 0x3a6   : > { %1293 = vsyncadd (!%p1058_p1), %s742_s17, 4294967040  ;;  %p22_p4 = scmp.ge.s32.totalorder %s1494_s8, 4   ;;  %s1666_s24 = smov %s1300_s25 }
 0x3a7   : > { %s1667_s25 = smov %s1304_s26  ;;  %s1668_s26 = smov %s1504_s19 }
 0x3a8   : > { %s1669_s27 = smov %s1494_s8  ;;  %24 = sbr.rel (!%p22_p4) target bundleno = 7 (0x7), region = 105 }
 0x3af   :  { %747 = vsyncpa [#allocation3], 1 }
 0x3b0   :  { %749 = vsyncpa [#allocation3 + $0x1], 1 }
 0x3b1   :  { %750 = vsyncpa [#allocation6], 1 }
 0x3b2   :  { %751 = vsyncpa [#allocation9], 1 }
 0x3b3   :  { %752 = vsyncpa [#allocation4], 1 }
 0x3b4   :  { %754 = vsyncpa [#allocation4 + $0x1], 1 }

</bundles_post_ra>
